<compile_context>
chip_gen: v6e
topology: v6e:2x2x1
jax: 0.10.0
libtpu: 0.0.40
codegen_flags: <defaults>
</compile_context>

<pallas_src>
import functools

import jax
import jax.numpy as jnp
from jax import lax
from jax.experimental import pallas as pl
from jax.experimental.pallas import tpu as pltpu

EPS = 1e-5
VMEM_LIMIT = 32 * 1024 * 1024  # safe on v5e/v6e/v7x; raise on v5e/v6e at real sizes


def _hardswish(v):
    return v * jnp.clip(v + 3.0, 0.0, 6.0) * (1.0 / 6.0)


# ---------------------------------------------------------------------------
# Fused kernel: conv_stem(3x3/s2)+BN+Hardswish -> dw3x3+BN+ReLU -> pw1x1+BN
#               -> + residual.  One grid step = one image, everything in VMEM.
# ---------------------------------------------------------------------------
def _fused_kernel(x_ref, wr_ref, s1_ref, b1_ref, dww_ref, dws_ref, dwb_ref,
                  pww_ref, pws_ref, pwb_ref, o_ref, *, ho, wo, ch):
    lanes = wo * ch
    bf = jnp.bfloat16

    # ---- conv_stem 3x3 / stride 2 as three per-kh MXU matmuls --------------
    # x_ref: (2, Ho+1, Kpad) — row-parity-split padded image; output row r
    # needs padded rows 2r (even[r]), 2r+1 (odd[r]), 2r+2 (even[r+1]), so all
    # reads are contiguous static slices (no strided / gathered access).
    even = x_ref[0]                                      # (Ho+1, Kpad)
    odd = x_ref[1]                                       # (Ho+1, Kpad)
    acc = jnp.dot(even[0:ho, :].astype(bf), wr_ref[0],
                  preferred_element_type=jnp.float32)
    acc = acc + jnp.dot(odd[0:ho, :].astype(bf), wr_ref[1],
                        preferred_element_type=jnp.float32)
    acc = acc + jnp.dot(even[1:ho + 1, :].astype(bf), wr_ref[2],
                        preferred_element_type=jnp.float32)

    # bn1 + Hardswish (f32, VPU).  y stays in vregs: it is the dw input AND
    # the residual; it is never written to HBM.
    y = _hardswish(acc * s1_ref[...] + b1_ref[...])      # (Ho, Wo*C)

    # ---- depthwise 3x3 + BN + ReLU, pure vreg accumulation -----------------
    # W-shifts are lane rotations on the XLU; the wrapped border lanes are
    # killed by zeros baked into the per-tap weights (no in-kernel masks).
    yl = pltpu.roll(y, shift=ch, axis=1)                 # y[., j-1, .]
    yr = pltpu.roll(y, shift=lanes - ch, axis=1)         # y[., j+1, .]

    def kw_sum(kh):
        t = 3 * kh
        return (yl * dww_ref[t + 0:t + 1, :]
                + y * dww_ref[t + 1:t + 2, :]
                + yr * dww_ref[t + 2:t + 3, :])

    zrow = jnp.zeros((1, lanes), jnp.float32)
    up = kw_sum(0)          # feeds output row r from y row r-1
    mid = kw_sum(1)
    dn = kw_sum(2)          # feeds output row r from y row r+1
    dw = (mid
          + jnp.concatenate([zrow, up[:ho - 1, :]], axis=0)
          + jnp.concatenate([dn[1:, :], zrow], axis=0))
    z = jnp.maximum(dw * dws_ref[...] + dwb_ref[...], 0.0)

    # ---- pointwise 1x1 as a reusable (128,128) block-diagonal MXU tile -----
    groups = lanes // 128
    zg = z.reshape(ho * groups, 128).astype(bf)
    pw = jnp.dot(zg, pww_ref[...],
                 preferred_element_type=jnp.float32).reshape(ho, lanes)

    # pw BN + residual; lane-dense 128-lane store.
    o_ref[...] = (pw * pws_ref[...] + pwb_ref[...] + y).astype(o_ref.dtype)


def fused_stem_block0(x_par, wrow3, s1, b1, dww, dws, dwb, pww, pws, pwb,
                      *, ho, wo, ch):
    n, _, hp2, kpad = x_par.shape
    lanes = wo * ch
    assert lanes % 128 == 0 and 128 % ch == 0
    kernel = functools.partial(_fused_kernel, ho=ho, wo=wo, ch=ch)
    return pl.pallas_call(
        kernel,
        out_shape=jax.ShapeDtypeStruct((n, ho, lanes), jnp.float32),
        grid=(n,),
        in_specs=[
            pl.BlockSpec((None, 2, hp2, kpad), lambda i: (i, 0, 0, 0)),
            pl.BlockSpec((3, kpad, lanes), lambda i: (0, 0, 0)),
            pl.BlockSpec((1, lanes), lambda i: (0, 0)),
            pl.BlockSpec((1, lanes), lambda i: (0, 0)),
            pl.BlockSpec((9, lanes), lambda i: (0, 0)),
            pl.BlockSpec((1, lanes), lambda i: (0, 0)),
            pl.BlockSpec((1, lanes), lambda i: (0, 0)),
            pl.BlockSpec((128, 128), lambda i: (0, 0)),
            pl.BlockSpec((1, lanes), lambda i: (0, 0)),
            pl.BlockSpec((1, lanes), lambda i: (0, 0)),
        ],
        out_specs=pl.BlockSpec((None, ho, lanes), lambda i: (i, 0, 0)),
        compiler_params=pltpu.CompilerParams(
            dimension_semantics=("parallel",),
            vmem_limit_bytes=VMEM_LIMIT,
        ),
    )(x_par, wrow3, s1, b1, dww, dws, dwb, pww, pws, pwb)


# ---------------------------------------------------------------------------
# Parameter folding / layout prep (host-side, done once in __init__)
# ---------------------------------------------------------------------------
def fold_bn(gamma, beta, mean, var):
    scale = gamma / jnp.sqrt(var + EPS)
    bias = beta - mean * scale
    return scale.astype(jnp.float32), bias.astype(jnp.float32)


class TimmBackbonePallas:
    """Synthetic MobileNetV3-style stem + first DS block of TimmBackbone."""

    def __init__(self, key, in_ch=3, stem_ch=16, input_hw=16):
        ks = list(jax.random.split(key, 8))

        def bn_params(k, c):
            k1, k2, k3, k4 = jax.random.split(k, 4)
            gamma = 0.5 + jax.random.uniform(k1, (c,), jnp.float32)
            beta = 0.1 * jax.random.normal(k2, (c,), jnp.float32)
            mean = 0.1 * jax.random.normal(k3, (c,), jnp.float32)
            var = 0.5 + jax.random.uniform(k4, (c,), jnp.float32)
            return gamma, beta, mean, var

        self.in_ch, self.stem_ch, self.hw = in_ch, stem_ch, input_hw
        # conv_stem: Conv2d(in_ch, stem_ch, 3, stride=2, pad=1, bias=False) (OIHW)
        self.stem_w = 0.2 * jax.random.normal(ks[0], (stem_ch, in_ch, 3, 3), jnp.float32)
        self.bn1 = bn_params(ks[1], stem_ch)
        # block 0: depthwise-separable conv (dw3x3 + BN + ReLU, pw1x1 + BN, residual)
        self.dw_w = 0.2 * jax.random.normal(ks[2], (stem_ch, 1, 3, 3), jnp.float32)
        self.bn_dw = bn_params(ks[3], stem_ch)
        self.pw_w = 0.2 * jax.random.normal(ks[4], (stem_ch, stem_ch, 1, 1), jnp.float32)
        self.bn_pw = bn_params(ks[5], stem_ch)

        self._build_kernel_params(input_hw)

    def _build_kernel_params(self, hw):
        cin, c = self.in_ch, self.stem_ch
        h = w = hw
        ho, wo = h // 2, w // 2
        lanes = wo * c
        assert lanes % 128 == 0 and 128 % c == 0, "toy sizes must be lane aligned"
        kraw = (w + 2) * cin
        kpad = ((kraw + 63) // 64) * 64      # pad per-kh contraction K (item: K align)
        self.ho, self.wo, self.lanes, self.kpad = ho, wo, lanes, kpad

        # conv_stem as three per-kh row-window matmuls:
        # wrow3[kh, p*cin + ci, j*c + co] = stem_w[co, ci, kh, kw] iff p == 2j + kw.
        w_t = jnp.transpose(self.stem_w, (2, 3, 1, 0))   # (kh, kw, cin, cout)
        wr = jnp.zeros((3, w + 2, cin, wo, c), jnp.float32)
        for j in range(wo):
            for kw in range(3):
                wr = wr.at[:, 2 * j + kw, :, j, :].set(w_t[:, kw])
        wr = wr.reshape(3, kraw, lanes)
        wr = jnp.pad(wr, ((0, 0), (0, kpad - kraw), (0, 0)))
        self.wrow3 = wr.astype(jnp.bfloat16)

        s1, b1 = fold_bn(*self.bn1)
        self.s1_t = jnp.tile(s1, wo).reshape(1, lanes)
        self.b1_t = jnp.tile(b1, wo).reshape(1, lanes)

        # Depthwise taps tiled across Wo; the wrapped-lane (W-border) tap
        # contributions are zeroed in the weights (kw=0 @ j=0, kw=2 @ j=Wo-1),
        # so the in-kernel pltpu.roll needs no masks.
        taps = jnp.transpose(self.dw_w[:, 0], (1, 2, 0)).reshape(9, c)  # (kh*3+kw, c)
        dww = jnp.tile(taps[:, None, :], (1, wo, 1)).reshape(9, lanes)
        ones = jnp.ones((lanes,), jnp.float32)
        border_l = (jnp.arange(lanes) >= c).astype(jnp.float32)          # kill j = 0
        border_r = (jnp.arange(lanes) < lanes - c).astype(jnp.float32)   # kill j = Wo-1
        masks = jnp.stack([border_l if kw == 0 else (border_r if kw == 2 else ones)
                           for _ in range(3) for kw in range(3)])
        self.dww = dww * masks
        s2, b2 = fold_bn(*self.bn_dw)
        self.dws = jnp.tile(s2, wo).reshape(1, lanes)
        self.dwb = jnp.tile(b2, wo).reshape(1, lanes)

        # Pointwise 1x1 as ONE reusable (128,128) block-diagonal bf16 MXU tile
        # (128/C w-positions of the (C,C) matrix on the diagonal).
        pw2d = jnp.transpose(self.pw_w[:, :, 0, 0])      # (cin=c, cout=c)
        self.pw_tile = jnp.kron(jnp.eye(128 // c, dtype=jnp.float32),
                                pw2d).astype(jnp.bfloat16)
        s3, b3 = fold_bn(*self.bn_pw)
        self.pws = jnp.tile(s3, wo).reshape(1, lanes)
        self.pwb = jnp.tile(b3, wo).reshape(1, lanes)

    def forward(self, x_nchw):
        """x_nchw: (N, Cin, H, W) f32 — returns a 1-tuple like the PyTorch module."""
        n, cin, h, w = x_nchw.shape
        assert cin == self.in_ch and h == self.hw and w == self.hw
        ho, wo, c = self.ho, self.wo, self.stem_ch
        kraw = (w + 2) * cin

        # NHWC + spatial zero-pad, then parity-split rows so the kernel's
        # strided (2r, 2r+1, 2r+2) row windows become contiguous reads.  This
        # touches only the tiny Cin-channel input; the stem activation itself
        # never leaves VMEM (no f32 intermediate HBM round trip).
        x = jnp.transpose(x_nchw, (0, 2, 3, 1))
        xp = jnp.pad(x, ((0, 0), (1, 1), (1, 1), (0, 0))).reshape(n, h + 2, kraw)
        xp = jnp.pad(xp, ((0, 0), (0, 0), (0, self.kpad - kraw)))
        x_par = xp.reshape(n, (h + 2) // 2, 2, self.kpad).transpose(0, 2, 1, 3)

        out = fused_stem_block0(x_par, self.wrow3, self.s1_t, self.b1_t,
                                self.dww, self.dws, self.dwb,
                                self.pw_tile, self.pws, self.pwb,
                                ho=ho, wo=wo, ch=c)
        out = out.reshape(n, ho, wo, c)
        return (jnp.transpose(out, (0, 3, 1, 2)),)   # back to NCHW like PyTorch


# ---------------------------------------------------------------------------
# Pure-JAX reference (mirrors the kernel's bf16-MXU / f32-epilogue numerics)
# ---------------------------------------------------------------------------
def ref_forward(x, m: TimmBackbonePallas):
    dn = ("NCHW", "OIHW", "NCHW")
    bf = jnp.bfloat16

    def bn(v, params):
        g, b, mu, var = params
        s = g / jnp.sqrt(var + EPS)
        return v * s[None, :, None, None] + (b - mu * s)[None, :, None, None]

    y = lax.conv_general_dilated(x.astype(bf), m.stem_w.astype(bf), (2, 2),
                                 ((1, 1), (1, 1)), dimension_numbers=dn,
                                 preferred_element_type=jnp.float32)
    y = bn(y, m.bn1)
    y = _hardswish(y)
    z = lax.conv_general_dilated(y, m.dw_w, (1, 1), ((1, 1), (1, 1)),
                                 dimension_numbers=dn,
                                 feature_group_count=m.stem_ch,
                                 precision=lax.Precision.HIGHEST)
    z = bn(z, m.bn_dw)
    z = jnp.maximum(z, 0.0)
    z = lax.conv_general_dilated(z.astype(bf), m.pw_w.astype(bf), (1, 1),
                                 ((0, 0), (0, 0)), dimension_numbers=dn,
                                 preferred_element_type=jnp.float32)
    z = bn(z, m.bn_pw)
    return z + y


if __name__ == "__main__":
    key = jax.random.PRNGKey(0)
    k_params, k_x = jax.random.split(key)

    model = TimmBackbonePallas(k_params, in_ch=3, stem_ch=16, input_hw=16)
    x = jax.random.normal(k_x, (2, 3, 16, 16), jnp.float32)  # NCHW, like PyTorch

    (out,) = model.forward(x)
    out = jax.block_until_ready(out)

    ref = jax.block_until_ready(ref_forward(x, model))
    assert out.shape == (2, 16, 8, 8), out.shape
    err = float(jnp.max(jnp.abs(out - ref)))
    # bf16 MXU operands -> compare at bf16-level tolerance.
    assert jnp.allclose(out, ref, atol=1e-2, rtol=1e-2), err

    print("KERNEL_OK")
</pallas_src>

<mosaic_0001>
module attributes {stable_mosaic.version = 11 : i64} {
  func.func @_fused_kernel(%arg0: i32, %arg1: memref<1x2x9x64xf32, #tpu.memory_space<vmem>>, %arg2: memref<3x64x128xbf16, #tpu.memory_space<vmem>>, %arg3: memref<1x128xf32, #tpu.memory_space<vmem>>, %arg4: memref<1x128xf32, #tpu.memory_space<vmem>>, %arg5: memref<9x128xf32, #tpu.memory_space<vmem>>, %arg6: memref<1x128xf32, #tpu.memory_space<vmem>>, %arg7: memref<1x128xf32, #tpu.memory_space<vmem>>, %arg8: memref<128x128xbf16, #tpu.memory_space<vmem>>, %arg9: memref<1x128xf32, #tpu.memory_space<vmem>>, %arg10: memref<1x128xf32, #tpu.memory_space<vmem>>, %arg11: memref<1x8x128xf32, #tpu.memory_space<vmem>>) attributes {dimension_semantics = [#tpu.dimension_semantics<parallel>], iteration_bounds = array<i64: 2>, scalar_prefetch = 0 : i64, scratch_operands = 0 : i64, tpu.core_type = #tpu.core_type<tc>, window_params = [{transform_indices = @transform_0, window_bounds = array<i64: 1, 2, 9, 64>}, {pipeline_mode = #tpu.pipeline_mode<synchronous>, transform_indices = @transform_1, window_bounds = array<i64: 3, 64, 128>}, {pipeline_mode = #tpu.pipeline_mode<synchronous>, transform_indices = @transform_2, window_bounds = array<i64: 1, 128>}, {pipeline_mode = #tpu.pipeline_mode<synchronous>, transform_indices = @transform_3, window_bounds = array<i64: 1, 128>}, {pipeline_mode = #tpu.pipeline_mode<synchronous>, transform_indices = @transform_4, window_bounds = array<i64: 9, 128>}, {pipeline_mode = #tpu.pipeline_mode<synchronous>, transform_indices = @transform_5, window_bounds = array<i64: 1, 128>}, {pipeline_mode = #tpu.pipeline_mode<synchronous>, transform_indices = @transform_6, window_bounds = array<i64: 1, 128>}, {pipeline_mode = #tpu.pipeline_mode<synchronous>, transform_indices = @transform_7, window_bounds = array<i64: 128, 128>}, {pipeline_mode = #tpu.pipeline_mode<synchronous>, transform_indices = @transform_8, window_bounds = array<i64: 1, 128>}, {pipeline_mode = #tpu.pipeline_mode<synchronous>, transform_indices = @transform_9, window_bounds = array<i64: 1, 128>}, {transform_indices = @transform_10, window_bounds = array<i64: 1, 8, 128>}]} {
    %c0 = arith.constant 0 : index
    %c0_0 = arith.constant 0 : index
    %c0_1 = arith.constant 0 : index
    %c0_2 = arith.constant 0 : index
    %0 = vector.load %arg1[%c0, %c0_0, %c0_1, %c0_2] : memref<1x2x9x64xf32, #tpu.memory_space<vmem>>, vector<1x1x9x64xf32>
    %1 = vector.shape_cast %0 : vector<1x1x9x64xf32> to vector<9x64xf32>
    %c0_3 = arith.constant 0 : index
    %c1 = arith.constant 1 : index
    %c0_4 = arith.constant 0 : index
    %c0_5 = arith.constant 0 : index
    %2 = vector.load %arg1[%c0_3, %c1, %c0_4, %c0_5] : memref<1x2x9x64xf32, #tpu.memory_space<vmem>>, vector<1x1x9x64xf32>
    %3 = vector.shape_cast %2 : vector<1x1x9x64xf32> to vector<9x64xf32>
    %4 = vector.extract_strided_slice %1 {offsets = [0, 0], sizes = [8, 64], strides = [1, 1]} : vector<9x64xf32> to vector<8x64xf32>
    %5 = arith.truncf %4 : vector<8x64xf32> to vector<8x64xbf16>
    %c0_6 = arith.constant 0 : index
    %c0_7 = arith.constant 0 : index
    %c0_8 = arith.constant 0 : index
    %6 = vector.load %arg2[%c0_6, %c0_7, %c0_8] : memref<3x64x128xbf16, #tpu.memory_space<vmem>>, vector<1x64x128xbf16>
    %7 = vector.shape_cast %6 : vector<1x64x128xbf16> to vector<64x128xbf16>
    %cst = arith.constant dense<0.000000e+00> : vector<8x128xf32>
    %8 = tpu.matmul %5, %7, %cst {dimension_numbers = #tpu.dot_dimension_numbers<[1], [0], [0], [1], [0, 0, 1, 1], [], []>} : vector<8x64xbf16>, vector<64x128xbf16>, vector<8x128xf32> -> vector<8x128xf32>
    %9 = vector.extract_strided_slice %3 {offsets = [0, 0], sizes = [8, 64], strides = [1, 1]} : vector<9x64xf32> to vector<8x64xf32>
    %10 = arith.truncf %9 : vector<8x64xf32> to vector<8x64xbf16>
    %c1_9 = arith.constant 1 : index
    %c0_10 = arith.constant 0 : index
    %c0_11 = arith.constant 0 : index
    %11 = vector.load %arg2[%c1_9, %c0_10, %c0_11] : memref<3x64x128xbf16, #tpu.memory_space<vmem>>, vector<1x64x128xbf16>
    %12 = vector.shape_cast %11 : vector<1x64x128xbf16> to vector<64x128xbf16>
    %cst_12 = arith.constant dense<0.000000e+00> : vector<8x128xf32>
    %13 = tpu.matmul %10, %12, %cst_12 {dimension_numbers = #tpu.dot_dimension_numbers<[1], [0], [0], [1], [0, 0, 1, 1], [], []>} : vector<8x64xbf16>, vector<64x128xbf16>, vector<8x128xf32> -> vector<8x128xf32>
    %14 = arith.addf %8, %13 : vector<8x128xf32>
    %15 = vector.extract_strided_slice %1 {offsets = [1, 0], sizes = [8, 64], strides = [1, 1]} : vector<9x64xf32> to vector<8x64xf32>
    %16 = arith.truncf %15 : vector<8x64xf32> to vector<8x64xbf16>
    %c2 = arith.constant 2 : index
    %c0_13 = arith.constant 0 : index
    %c0_14 = arith.constant 0 : index
    %17 = vector.load %arg2[%c2, %c0_13, %c0_14] : memref<3x64x128xbf16, #tpu.memory_space<vmem>>, vector<1x64x128xbf16>
    %18 = vector.shape_cast %17 : vector<1x64x128xbf16> to vector<64x128xbf16>
    %cst_15 = arith.constant dense<0.000000e+00> : vector<8x128xf32>
    %19 = tpu.matmul %16, %18, %cst_15 {dimension_numbers = #tpu.dot_dimension_numbers<[1], [0], [0], [1], [0, 0, 1, 1], [], []>} : vector<8x64xbf16>, vector<64x128xbf16>, vector<8x128xf32> -> vector<8x128xf32>
    %20 = arith.addf %14, %19 : vector<8x128xf32>
    %c0_16 = arith.constant 0 : index
    %c0_17 = arith.constant 0 : index
    %21 = vector.load %arg3[%c0_16, %c0_17] : memref<1x128xf32, #tpu.memory_space<vmem>>, vector<1x128xf32>
    %22 = vector.broadcast %21 : vector<1x128xf32> to vector<8x128xf32>
    %23 = arith.mulf %20, %22 : vector<8x128xf32>
    %c0_18 = arith.constant 0 : index
    %c0_19 = arith.constant 0 : index
    %24 = vector.load %arg4[%c0_18, %c0_19] : memref<1x128xf32, #tpu.memory_space<vmem>>, vector<1x128xf32>
    %25 = vector.broadcast %24 : vector<1x128xf32> to vector<8x128xf32>
    %26 = arith.addf %23, %25 : vector<8x128xf32>
    %cst_20 = arith.constant 3.000000e+00 : f32
    %27 = vector.broadcast %cst_20 : f32 to vector<8x128xf32>
    %28 = arith.addf %26, %27 : vector<8x128xf32>
    %cst_21 = arith.constant 0.000000e+00 : f32
    %cst_22 = arith.constant 6.000000e+00 : f32
    %29 = vector.broadcast %cst_21 : f32 to vector<8x128xf32>
    %30 = arith.maximumf %29, %28 : vector<8x128xf32>
    %31 = vector.broadcast %cst_22 : f32 to vector<8x128xf32>
    %32 = arith.minimumf %31, %30 : vector<8x128xf32>
    %33 = arith.mulf %26, %32 : vector<8x128xf32>
    %cst_23 = arith.constant 0.166666672 : f32
    %34 = vector.broadcast %cst_23 : f32 to vector<8x128xf32>
    %35 = arith.mulf %33, %34 : vector<8x128xf32>
    %c16_i32 = arith.constant 16 : i32
    %36 = tpu.dynamic_rotate %35 by %c16_i32 dim 1 : vector<8x128xf32>, i32 -> vector<8x128xf32>
    %c112_i32 = arith.constant 112 : i32
    %37 = tpu.dynamic_rotate %35 by %c112_i32 dim 1 : vector<8x128xf32>, i32 -> vector<8x128xf32>
    %cst_24 = arith.constant 0.000000e+00 : f32
    %38 = vector.broadcast %cst_24 : f32 to vector<1x128xf32>
    %c0_25 = arith.constant 0 : index
    %c0_26 = arith.constant 0 : index
    %39 = vector.load %arg5[%c0_25, %c0_26] : memref<9x128xf32, #tpu.memory_space<vmem>>, vector<1x128xf32>
    %40 = vector.broadcast %39 : vector<1x128xf32> to vector<8x128xf32>
    %41 = arith.mulf %36, %40 : vector<8x128xf32>
    %c1_27 = arith.constant 1 : index
    %c0_28 = arith.constant 0 : index
    %42 = vector.load %arg5[%c1_27, %c0_28] : memref<9x128xf32, #tpu.memory_space<vmem>>, vector<1x128xf32>
    %43 = vector.broadcast %42 : vector<1x128xf32> to vector<8x128xf32>
    %44 = arith.mulf %35, %43 : vector<8x128xf32>
    %45 = arith.addf %41, %44 : vector<8x128xf32>
    %c2_29 = arith.constant 2 : index
    %c0_30 = arith.constant 0 : index
    %46 = vector.load %arg5[%c2_29, %c0_30] : memref<9x128xf32, #tpu.memory_space<vmem>>, vector<1x128xf32>
    %47 = vector.broadcast %46 : vector<1x128xf32> to vector<8x128xf32>
    %48 = arith.mulf %37, %47 : vector<8x128xf32>
    %49 = arith.addf %45, %48 : vector<8x128xf32>
    %c3 = arith.constant 3 : index
    %c0_31 = arith.constant 0 : index
    %50 = vector.load %arg5[%c3, %c0_31] : memref<9x128xf32, #tpu.memory_space<vmem>>, vector<1x128xf32>
    %51 = vector.broadcast %50 : vector<1x128xf32> to vector<8x128xf32>
    %52 = arith.mulf %36, %51 : vector<8x128xf32>
    %c4 = arith.constant 4 : index
    %c0_32 = arith.constant 0 : index
    %53 = vector.load %arg5[%c4, %c0_32] : memref<9x128xf32, #tpu.memory_space<vmem>>, vector<1x128xf32>
    %54 = vector.broadcast %53 : vector<1x128xf32> to vector<8x128xf32>
    %55 = arith.mulf %35, %54 : vector<8x128xf32>
    %56 = arith.addf %52, %55 : vector<8x128xf32>
    %c5 = arith.constant 5 : index
    %c0_33 = arith.constant 0 : index
    %57 = vector.load %arg5[%c5, %c0_33] : memref<9x128xf32, #tpu.memory_space<vmem>>, vector<1x128xf32>
    %58 = vector.broadcast %57 : vector<1x128xf32> to vector<8x128xf32>
    %59 = arith.mulf %37, %58 : vector<8x128xf32>
    %60 = arith.addf %56, %59 : vector<8x128xf32>
    %c6 = arith.constant 6 : index
    %c0_34 = arith.constant 0 : index
    %61 = vector.load %arg5[%c6, %c0_34] : memref<9x128xf32, #tpu.memory_space<vmem>>, vector<1x128xf32>
    %62 = vector.broadcast %61 : vector<1x128xf32> to vector<8x128xf32>
    %63 = arith.mulf %36, %62 : vector<8x128xf32>
    %c7 = arith.constant 7 : index
    %c0_35 = arith.constant 0 : index
    %64 = vector.load %arg5[%c7, %c0_35] : memref<9x128xf32, #tpu.memory_space<vmem>>, vector<1x128xf32>
    %65 = vector.broadcast %64 : vector<1x128xf32> to vector<8x128xf32>
    %66 = arith.mulf %35, %65 : vector<8x128xf32>
    %67 = arith.addf %63, %66 : vector<8x128xf32>
    %c8 = arith.constant 8 : index
    %c0_36 = arith.constant 0 : index
    %68 = vector.load %arg5[%c8, %c0_36] : memref<9x128xf32, #tpu.memory_space<vmem>>, vector<1x128xf32>
    %69 = vector.broadcast %68 : vector<1x128xf32> to vector<8x128xf32>
    %70 = arith.mulf %37, %69 : vector<8x128xf32>
    %71 = arith.addf %67, %70 : vector<8x128xf32>
    %72 = vector.extract_strided_slice %49 {offsets = [0, 0], sizes = [7, 128], strides = [1, 1]} : vector<8x128xf32> to vector<7x128xf32>
    %73 = tpu.concatenate %38, %72 in 0 : vector<1x128xf32>, vector<7x128xf32> -> vector<8x128xf32>
    %74 = arith.addf %60, %73 : vector<8x128xf32>
    %75 = vector.extract_strided_slice %71 {offsets = [1, 0], sizes = [7, 128], strides = [1, 1]} : vector<8x128xf32> to vector<7x128xf32>
    %76 = tpu.concatenate %75, %38 in 0 : vector<7x128xf32>, vector<1x128xf32> -> vector<8x128xf32>
    %77 = arith.addf %74, %76 : vector<8x128xf32>
    %c0_37 = arith.constant 0 : index
    %c0_38 = arith.constant 0 : index
    %78 = vector.load %arg6[%c0_37, %c0_38] : memref<1x128xf32, #tpu.memory_space<vmem>>, vector<1x128xf32>
    %79 = vector.broadcast %78 : vector<1x128xf32> to vector<8x128xf32>
    %80 = arith.mulf %77, %79 : vector<8x128xf32>
    %c0_39 = arith.constant 0 : index
    %c0_40 = arith.constant 0 : index
    %81 = vector.load %arg7[%c0_39, %c0_40] : memref<1x128xf32, #tpu.memory_space<vmem>>, vector<1x128xf32>
    %82 = vector.broadcast %81 : vector<1x128xf32> to vector<8x128xf32>
    %83 = arith.addf %80, %82 : vector<8x128xf32>
    %cst_41 = arith.constant 0.000000e+00 : f32
    %84 = vector.broadcast %cst_41 : f32 to vector<8x128xf32>
    %85 = arith.maximumf %83, %84 : vector<8x128xf32>
    %86 = arith.truncf %85 : vector<8x128xf32> to vector<8x128xbf16>
    %c0_42 = arith.constant 0 : index
    %c0_43 = arith.constant 0 : index
    %87 = vector.load %arg8[%c0_42, %c0_43] : memref<128x128xbf16, #tpu.memory_space<vmem>>, vector<128x128xbf16>
    %cst_44 = arith.constant dense<0.000000e+00> : vector<8x128xf32>
    %88 = tpu.matmul %86, %87, %cst_44 {dimension_numbers = #tpu.dot_dimension_numbers<[1], [0], [0], [1], [0, 0, 1, 1], [], []>} : vector<8x128xbf16>, vector<128x128xbf16>, vector<8x128xf32> -> vector<8x128xf32>
    %c0_45 = arith.constant 0 : index
    %c0_46 = arith.constant 0 : index
    %89 = vector.load %arg9[%c0_45, %c0_46] : memref<1x128xf32, #tpu.memory_space<vmem>>, vector<1x128xf32>
    %90 = vector.broadcast %89 : vector<1x128xf32> to vector<8x128xf32>
    %91 = arith.mulf %88, %90 : vector<8x128xf32>
    %c0_47 = arith.constant 0 : index
    %c0_48 = arith.constant 0 : index
    %92 = vector.load %arg10[%c0_47, %c0_48] : memref<1x128xf32, #tpu.memory_space<vmem>>, vector<1x128xf32>
    %93 = vector.broadcast %92 : vector<1x128xf32> to vector<8x128xf32>
    %94 = arith.addf %91, %93 : vector<8x128xf32>
    %95 = arith.addf %94, %35 : vector<8x128xf32>
    %c0_49 = arith.constant 0 : index
    %c0_50 = arith.constant 0 : index
    %c0_51 = arith.constant 0 : index
    %96 = vector.load %arg11[%c0_49, %c0_50, %c0_51] : memref<1x8x128xf32, #tpu.memory_space<vmem>>, vector<1x8x128xf32>
    %97 = vector.shape_cast %96 : vector<1x8x128xf32> to vector<8x128xf32>
    %98 = vector.shape_cast %95 : vector<8x128xf32> to vector<1x8x128xf32>
    tpu.vector_store %arg11[%c0_49, %c0_50, %c0_51], %98 {strides = array<i32>} : memref<1x8x128xf32, #tpu.memory_space<vmem>>, vector<1x8x128xf32>,
    return
  }
  func.func @transform_0(%arg0: i32) -> (i32, i32, i32, i32) {
    %c0_i32 = arith.constant 0 : i32
    %c0_i32_0 = arith.constant 0 : i32
    %c0_i32_1 = arith.constant 0 : i32
    %c0_i32_2 = arith.constant 0 : i32
    return %arg0, %c0_i32, %c0_i32_0, %c0_i32_1 : i32, i32, i32, i32
  }
  func.func @transform_1(%arg0: i32) -> (i32, i32, i32) {
    %c0_i32 = arith.constant 0 : i32
    %c0_i32_0 = arith.constant 0 : i32
    %c0_i32_1 = arith.constant 0 : i32
    %c0_i32_2 = arith.constant 0 : i32
    return %c0_i32, %c0_i32_0, %c0_i32_1 : i32, i32, i32
  }
  func.func @transform_2(%arg0: i32) -> (i32, i32) {
    %c0_i32 = arith.constant 0 : i32
    %c0_i32_0 = arith.constant 0 : i32
    %c0_i32_1 = arith.constant 0 : i32
    return %c0_i32, %c0_i32_0 : i32, i32
  }
  func.func @transform_3(%arg0: i32) -> (i32, i32) {
    %c0_i32 = arith.constant 0 : i32
    %c0_i32_0 = arith.constant 0 : i32
    %c0_i32_1 = arith.constant 0 : i32
    return %c0_i32, %c0_i32_0 : i32, i32
  }
  func.func @transform_4(%arg0: i32) -> (i32, i32) {
    %c0_i32 = arith.constant 0 : i32
    %c0_i32_0 = arith.constant 0 : i32
    %c0_i32_1 = arith.constant 0 : i32
    return %c0_i32, %c0_i32_0 : i32, i32
  }
  func.func @transform_5(%arg0: i32) -> (i32, i32) {
    %c0_i32 = arith.constant 0 : i32
    %c0_i32_0 = arith.constant 0 : i32
    %c0_i32_1 = arith.constant 0 : i32
    return %c0_i32, %c0_i32_0 : i32, i32
  }
  func.func @transform_6(%arg0: i32) -> (i32, i32) {
    %c0_i32 = arith.constant 0 : i32
    %c0_i32_0 = arith.constant 0 : i32
    %c0_i32_1 = arith.constant 0 : i32
    return %c0_i32, %c0_i32_0 : i32, i32
  }
  func.func @transform_7(%arg0: i32) -> (i32, i32) {
    %c0_i32 = arith.constant 0 : i32
    %c0_i32_0 = arith.constant 0 : i32
    %c0_i32_1 = arith.constant 0 : i32
    return %c0_i32, %c0_i32_0 : i32, i32
  }
  func.func @transform_8(%arg0: i32) -> (i32, i32) {
    %c0_i32 = arith.constant 0 : i32
    %c0_i32_0 = arith.constant 0 : i32
    %c0_i32_1 = arith.constant 0 : i32
    return %c0_i32, %c0_i32_0 : i32, i32
  }
  func.func @transform_9(%arg0: i32) -> (i32, i32) {
    %c0_i32 = arith.constant 0 : i32
    %c0_i32_0 = arith.constant 0 : i32
    %c0_i32_1 = arith.constant 0 : i32
    return %c0_i32, %c0_i32_0 : i32, i32
  }
  func.func @transform_10(%arg0: i32) -> (i32, i32, i32) {
    %c0_i32 = arith.constant 0 : i32
    %c0_i32_0 = arith.constant 0 : i32
    %c0_i32_1 = arith.constant 0 : i32
    return %arg0, %c0_i32, %c0_i32_0 : i32, i32, i32
  }
}

</mosaic_0001>

<bundles_post_ra>
// kernel: tpu_custom_call.1
= control target key start
LH: loop header
LB: loop body
LE: loop exit
PB: predicated region body
PF: predicated region fallthrough
CT: control target
= control target key end

     0   :  { %15 = vsyncpa [#allocation3], 0  ;;  %s1618_s0 = inlined_call_operand.vmem [shape: f32[2,2,9,64], index: 0, kind: input, shape index: {}]   ;;  %s1619_s1 = inlined_call_operand.vmem [shape: bf16[3,64,128], index: 1, kind: input, shape index: {}]   ;;  %s1620_s2 = inlined_call_operand.vmem [shape: f32[1,128], index: 2, kind: input, shape index: {}]   ;;  %s1621_s3 = inlined_call_operand.vmem [shape: f32[1,128], index: 3, kind: input, shape index: {}]   ;;  %s1622_s4 = inlined_call_operand.hbm [shape: f32[9,128], index: 4, kind: input, shape index: {}]   ;;  %s1623_s5 = inlined_call_operand.vmem [shape: f32[1,128], index: 5, kind: input, shape index: {}]   ;;  %s1624_s6 = inlined_call_operand.vmem [shape: f32[1,128], index: 6, kind: input, shape index: {}]   ;;  %s1625_s7 = inlined_call_operand.hbm [shape: bf16[128,128], index: 7, kind: input, shape index: {}]   ;;  %s1626_s8 = inlined_call_operand.vmem [shape: f32[1,128], index: 8, kind: input, shape index: {}]   ;;  %s1627_s9 = inlined_call_operand.vmem [shape: f32[1,128], index: 9, kind: input, shape index: {}]   ;;  %s1628_s10 = inlined_call_operand.hbm [shape: f32[2,8,128], index: 10, kind: output, shape index: {}]  }
   0x1   :  { %16 = vsyncpa [#allocation6], 0 }
   0x2   :  { %17 = vsyncpa [#allocation4], 0 }
   0x3   :  { %19 = vsyncpa [#allocation4 + $0x1], 0  ;;  %s1391_s13 = smov 0   ;;  %s1393_s14 = smov 0  }
   0x4   :  { %s1395_s15 = smov 0   ;;  %s1397_s16 = smov 0  }
   0x5 LB: > { %1631 = sst [smem:[#allocation11_spill]] %s1319_s15  ;;  %s1412_s17 = sadd.s32 4294967295, %s1323_s16   ;;  %s1323_s16 = sphi %s1397_s16, %s1646_s16   ;;  %s1319_s15 = sphi %s1395_s15, %s1643_s15   ;;  %s1315_s14 = sphi %s1393_s14, %s1645_s14   ;;  %s1311_s13 = sphi %s1391_s13, %s1644_s13  }
   0x6   : > { %s964_s18 = sadd.s32 4294967294, %s1323_s16   ;;  %s1416_s19 = sadd.s32 1, %s1323_s16  }
   0x7   : > { %s247_s20 = sadd.s32 1, %s1319_s15  ;;  %s244_s21 = ssub.s32 %s1323_s16, %s1416_s19 }
   0x8   : > { %p257_p0 = scmp.ne.s32.totalorder %s1319_s15, %s1315_s14  ;;  %p245_p1 = scmp.eq.s32.totalorder %s244_s21, 0 }
   0x9   : > { %p258_p2 = scmp.eq.s32.totalorder %s1412_s17, 1  ;;  %p263_p3 = scmp.ne.s32.totalorder %s1315_s14, %s1311_s13 }
   0xa   : > { %p264_p4 = scmp.eq.s32.totalorder %s964_s18, 1  ;;  %p965_p7 = scmp.ge.s32.totalorder %s1323_s16, 1 }
   0xb   : > { %s1427_s22 = scalar_select %p245_p1, %s1319_s15, %s247_s20  }
   0xc   : > { %p1429_p5 = por %p258_p2, %p257_p0  ;;  %p1433_p6 = por %p264_p4, %p263_p3 }
   0xd   : > { %1632 = sst [smem:[#allocation12_spill]] %s1427_s22  ;;  %p271_p8 = scmp.lt.s32.totalorder %s1323_s16, 3 }
   0xe   : > { %s1634_s24 = scalar_select %p1433_p6, 1, 0 }
   0xf   : > { %p1629_p9 = scmp.eq.s32.totalorder %s1412_s17, 0  ;;  %p1440_p10 = pnand %p965_p7, %p271_p8 }
  0x10   : > { %s1325_s26 = smov [#allocation2]   ;;  %s1326_s29 = smov [#allocation5]  }
  0x11   : > { %s292_s27 = sshll.u32 %s1325_s26, 4  ;;  %p1125_p11 = pneg %p1440_p10  ;;  %s293_s27 = int_to_ptr.vmem [resolvable:$true] %s292_s27 }
  0x12   : > { %s311_s30 = sshll.u32 %s1326_s29, 4  ;;  %s1214_s11 = scalar_lea.vmem %s293_s27, 256  ;;  %s312_s30 = int_to_ptr.vmem [resolvable:$true] %s311_s30 }
  0x13   : > { %p1448_p12 = pnand %p1629_p9, %p1125_p11  ;;  %p1215_p0 = scmp.ne.s32.totalorder %s293_s27, %s1214_s11 }
  0x14   : > { %p1222_p3 = scmp.lt.s32.totalorder %s293_s27, %s293_s27  ;;  %p1223_p4 = scmp.lt.s32.totalorder %s1214_s11, %s1214_s11 }
  0x15   : > { %p1205_p13 = pneg %p1448_p12 }
  0x16   : > { %p1224_p7 = por %p1223_p4, %p1222_p3 }
  0x17   : > { %p1217_p1 = pnand %p1215_p0, %p1205_p13 }
  0x19   : > { %p1218_p2 = pneg %p1217_p1 }
  0x1b   : > { %p1225_p8 = pnand %p1224_p7, %p1218_p2 }
  0x1d   : > { %1228 = shalt.err (!%p1225_p8)
}
  0x1e   : > { %s1327_s12 = smov 128   ;;  %s1328_s18 = smov 8  }
  0x1f   : > { %1128 = dma.hbm_to_vmem [thread:$0]  (!%p1448_p12), %s1622_s4, 256, %s293_s27, [#allocation3], %s1327_s12, %s1327_s12, %s1328_s18  }
  0x20   : > { %s1240_s26 = scalar_lea.vmem %s312_s30, 1024  ;;  %p1248_p9 = scmp.lt.s32.totalorder %s312_s30, %s312_s30 }
  0x21   : > { %p1241_p11 = scmp.ne.s32.totalorder %s312_s30, %s1240_s26  ;;  %p1249_p6 = scmp.lt.s32.totalorder %s1240_s26, %s1240_s26 }
  0x23   : > { %p1243_p0 = pnand %p1241_p11, %p1205_p13  ;;  %p1250_p3 = por %p1249_p6, %p1248_p9 }
  0x25   : > { %p1244_p1 = pneg %p1243_p0 }
  0x27   : > { %p1251_p2 = pnand %p1250_p3, %p1244_p1 }
  0x29   : > { %1254 = shalt.err (!%p1251_p2)
}
  0x2a   : > { %s1329_s29 = smov 64   ;;  %s1330_s11 = smov 4  }
  0x2b   : > { %1131 = dma.hbm_to_vmem [thread:$0]  (!%p1448_p12), %s1625_s7, 1024, %s312_s30, [#allocation6], %s1329_s29, %s1329_s29, %s1330_s11  }
  0x2c   : > { %341 = sbr.rel (%p1440_p10) target bundleno = 646 (0x286), region = 60  ;;  %p1637_p4 = scmp.eq.s32.totalorder (!%p1440_p10), %s1412_s17, 0 }
  0x31   : > { %1298 = dma.done.wait (%p1637_p4), [#allocation3], 256   ;;  %p1638_p13 = pmov %p1637_p4 }
  0x32   : > { %p1639_p6 = pmov %p1637_p4 }
  0x33   : > { %1300 = vsyncadd (%p1638_p13), [#allocation3], 4294967040 }
  0x34   : > { %1302 = dma.done.wait (%p1639_p6), [#allocation6], 1024   ;;  %p1640_p9 = pmov %p1637_p4 }
  0x35   : > { %v1331_v0 = vmov 0.0   ;;  %vm1332_vm0 = vmmov 0   ;;  %p383_p10 = scmp.lt.s32.totalorder %s1412_s17, 1  ;;  %v1183_v1 = vld [vmem:[%s1619_s1 + $0x38] sm:$0xff]   ;;  %v1185_v3 = vld [vmem:[%s1619_s1 + $0x30] sm:$0xff]   ;;  %v1187_v5 = vld [vmem:[%s1619_s1 + $0x28] sm:$0xff]  }
  0x36   : > { %1304 = vsyncadd (%p1640_p9), [#allocation6], 4294966272  ;;  %1059 = vmatprep.subr.bf16.mxu0 %v1331_v0  ;;  %1071 = vmatprep.subr.bf16.mxu1 %v1331_v0  ;;  %v1184_v2 = vld [vmem:[%s1619_s1 + $0x18] sm:$0xff]   ;;  %v1186_v4 = vld [vmem:[%s1619_s1 + $0x10] sm:$0xff]   ;;  %vm436_vm1 = vcmask 523264   ;;  %s1333_s18 = smov 16  }
  0x37   : > { %1067 = vmatprep.mubr.msk.bf16.mxu0 %vm1332_vm0, %v1331_v0  ;;  %1079 = vmatprep.mubr.msk.bf16.mxu1 %vm1332_vm0, %v1331_v0  ;;  %s384_s25 = scalar_select %p383_p10, %s1412_s17, 1  ;;  %v1188_v6 = vld [vmem:[%s1619_s1 + $0x8] sm:$0xff]   ;;  %v1189_v7 = vld [vmem:[%s1619_s1 + $0x20] sm:$0xff]   ;;  %v1191_v13 = vld [vmem:[%s1619_s1 + $0x58] sm:$0xff]   ;;  %vm720_vm2 = vcmask 1040384   ;;  %vm726_vm3 = vcmask 1046528  }
  0x38   : > { %1060 = vmatpush3.bf16.msra.mxu0 %v1183_v1  ;;  %1072 = vmatpush3.bf16.msra.mxu1 %v1184_v2  ;;  %v1190_v8 = vld [vmem:[%s1619_s1] sm:$0xff]   ;;  %v1192_v16 = vld [vmem:[%s1619_s1 + $0x50] sm:$0xff]   ;;  %v1193_v18 = vld [vmem:[%s1619_s1 + $0x48] sm:$0xff]   ;;  %s1334_s20 = smov 112   ;;  %s380_s15 = sand.u32 1, %s1315_s14  }
  0x39   : > { %1061 = vmatprep.subr.bf16.mxu0 %v1331_v0  ;;  %1073 = vmatprep.subr.bf16.mxu1 %v1331_v0  ;;  %s1034_s21 = sshll.u32 %s384_s25, 5  ;;  %v1194_v21 = vld [vmem:[%s1619_s1 + $0x40] sm:$0xff]   ;;  %v1195_v23 = vld [vmem:[#allocation5 + $0x38] sm:$0xff]   ;;  %v1197_v39 = vld [vmem:[#allocation5 + $0x28] sm:$0xff]   ;;  %s972_s22 = sshll.u32 %s380_s15, 3 }
  0x3a   : > { %s387_s28 = scalar_lea.vmem %s1618_s0, %s1034_s21  ;;  %v1196_v24 = vld [vmem:[#allocation5 + $0x30] sm:$0xff]   ;;  %v1198_v45 = vld [vmem:[#allocation5 + $0x20] sm:$0xff]   ;;  %v1199_v47 = vld [vmem:[#allocation5 + $0x18] sm:$0xff]   ;;  %s1031_s12 = sshll.u32 %s1412_s17, 7 }
  0x3b   : > { %v975_v9 = vld [vmem:[%s387_s28 + $0x10] sm:$0xff]  ;;  %v389_v10 = vld [vmem:[%s387_s28] sm:$0xff]  ;;  %v390_v11 = vld [vmem:[%s387_s28 + $0x8] sm:$0x1]  ;;  %s1583_s29 = scalar_lea.hbm %s1628_s10, %s1031_s12  ;;  %s870_s11 = scalar_lea.sflag [#allocation4], %s380_s15 }
  0x3c   : > { %1062 = vmatpush3.bf16.msra.mxu0 %v1185_v3  ;;  %1074 = vmatpush3.bf16.msra.mxu1 %v1186_v4  ;;  %v402_v12 = vpack.c.bf16 %v975_v9, %v975_v9  ;;  %v393_v14 = vpack.c.bf16 %v389_v10, %v389_v10  ;;  %v547_v15 = vpack.c.bf16 %v390_v11, %v389_v10  ;;  %v1007_v35 = vld [vmem:[%s1620_s2] ss:$0 sm:$0xff]  ;;  %v1201_v52 = vld [vmem:[#allocation5 + $0x8] sm:$0xff]   ;;  %v1202_v53 = vld [vmem:[#allocation5] sm:$0xff]   ;;  %s1335_s17 = smov [#allocation7]  }
  0x3d   : > { %1063 = vmatprep.subr.bf16.mxu0 %v1331_v0  ;;  %1075 = vmatprep.subr.bf16.mxu1 %v1331_v0  ;;  %v1008_v37 = vld [vmem:[%s1621_s3] ss:$0 sm:$0xff]  ;;  %v1015_v55 = vld [vmem:[#allocation2 + $0x6] ss:$0 sm:$0xff]  ;;  %v1010_v56 = vld [vmem:[#allocation2 + $0x1] ss:$0 sm:$0xff] }
  0x3e   : > { %v560_v17 = vshll.u32 %v547_v15, 16  ;;  %v558_v19 = vshrl.u32 %v547_v15, 16  ;;  %v1200_v50 = vld [vmem:[#allocation5 + $0x10] sm:$0xff]   ;;  %v1017_v63 = vld [vmem:[#allocation2 + $0x8] ss:$0 sm:$0xff] }
  0x3f   : > { %v1009_v54 = vld [vmem:[#allocation2] ss:$0 sm:$0xff]  ;;  %v1016_v57 = vld [vmem:[#allocation2 + $0x7] ss:$0 sm:$0xff]  ;;  %v1012_v59 = vld [vmem:[#allocation2 + $0x3] ss:$0 sm:$0xff] }
  0x40   : > { %1064 = vmatpush3.bf16.msra.mxu0 %v1187_v5  ;;  %1076 = vmatpush3.bf16.msra.mxu1 %v1188_v6  ;;  %v562_v20 = vrot.slane %v560_v17, 1  ;;  %v1011_v62 = vld [vmem:[#allocation2 + $0x2] ss:$0 sm:$0xff]  ;;  %v1013_v1 = vld [vmem:[#allocation2 + $0x4] ss:$0 sm:$0xff] }
  0x41   : > { %1065 = vmatprep.subr.bf16.mxu0 %v1331_v0  ;;  %1077 = vmatprep.subr.bf16.mxu1 %v1331_v0  ;;  %v1014_v4 = vld [vmem:[#allocation2 + $0x5] ss:$0 sm:$0xff] }
  0x42   : > { %v563_v22 = vor.u32 %v562_v20, %v558_v19  ;;  %v1018_v20 = vld [vmem:[%s1623_s5] ss:$0 sm:$0xff] }
  0x44   : > { %1066 = vmatpush3.bf16.msra.mxu0 %v1189_v7  ;;  %1078 = vmatpush3.bf16.msra.mxu1 %v1190_v8 }
  0x45   : > { %1083 = vmatprep.subr.bf16.mxu0 %v1331_v0  ;;  %1095 = vmatprep.subr.bf16.mxu1 %v1331_v0 }
  0x47   : > { %1068 = vmatmul.mubr.msk.bf16.vlgmr.msra.gmra.mxu0 %vm436_vm1, %v402_v12  ;;  %1080 = vmatmul.mubr.msk.bf16.vlgmr.msra.gmra.mxu1 %vm436_vm1, %v393_v14 }
  0x48   : > { %1084 = vmatpush3.bf16.msra.mxu0 %v1191_v13  ;;  %1091 = vmatprep.mubr.msk.bf16.mxu0 %vm1332_vm0, %v1331_v0 }
  0x49   : > { %1085 = vmatprep.subr.bf16.mxu0 %v1331_v0  ;;  %1111 = vmatprep.mubr.msk.bf16.mxu1 %vm1332_vm0, %v1331_v0 }
  0x4a   : > { %1096 = vmatpush3.bf16.msra.mxu1 %v1195_v23  ;;  %v1019_v23 = vld [vmem:[%s1624_s6] ss:$0 sm:$0xff] }
  0x4b   : > { %1097 = vmatprep.subr.bf16.mxu1 %v1331_v0 }
  0x4c   : > { %1086 = vmatpush3.bf16.msra.mxu0 %v1192_v16 }
  0x4d   : > { %1087 = vmatprep.subr.bf16.mxu0 %v1331_v0 }
  0x4e   : > { %1098 = vmatpush3.bf16.msra.mxu1 %v1196_v24 }
  0x4f   : > { %1099 = vmatprep.subr.bf16.mxu1 %v1331_v0 }
  0x50   : > { %1088 = vmatpush3.bf16.msra.mxu0 %v1193_v18 }
  0x51   : > { %1089 = vmatprep.subr.bf16.mxu0 %v1331_v0 }
  0x52   : > { %1100 = vmatpush3.bf16.msra.mxu1 %v1197_v39 }
  0x53   : > { %1101 = vmatprep.subr.bf16.mxu1 %v1331_v0 }
  0x54   : > { %1090 = vmatpush3.bf16.msra.mxu0 %v1194_v21 }
  0x56   : > { %1102 = vmatpush3.bf16.msra.mxu1 %v1198_v45 }
  0x57   : > { %1092 = vmatmul.mubr.msk.bf16.vlgmr.msra.gmra.mxu0 %vm436_vm1, %v563_v22  ;;  %1103 = vmatprep.subr.bf16.mxu1 %v1331_v0 }
  0x5a   : > { %1104 = vmatpush3.bf16.msra.mxu1 %v1199_v47 }
  0x5b   : > { %1105 = vmatprep.subr.bf16.mxu1 %v1331_v0 }
  0x5e   : > { %1106 = vmatpush3.bf16.msra.mxu1 %v1200_v50 }
  0x5f   : > { %1107 = vmatprep.subr.bf16.mxu1 %v1331_v0 }
  0x62   : > { %1108 = vmatpush3.bf16.msra.mxu1 %v1201_v52 }
  0x63   : > { %1109 = vmatprep.subr.bf16.mxu1 %v1331_v0 }
  0x66   : > { %1110 = vmatpush3.bf16.msra.mxu1 %v1202_v53 }
 0x107   : > { %v474_v25 = vpop.f32.mrf.mxu0  ;;  %v541_v26 = vpop.f32.mrf.mxu1 }
 0x108   : > { %v542_v33 = vadd.f32 %v541_v26, %v474_v25 }
 0x109   : > { %v1069_v27 = vpop.f32.mrf.mxu0  ;;  %v1081_v28 = vpop.f32.mrf.mxu1 }
 0x10a   : > { %v1028_v28 = vld [vmem:[%s1626_s8] ss:$0 sm:$0xff] }
 0x10b   : > { %v477_v29 = vpop.f32.mrf.mxu0  ;;  %v544_v30 = vpop.f32.mrf.mxu1 }
 0x10c   : > { %v1029_v30 = vld [vmem:[%s1627_s9] ss:$0 sm:$0xff] }
 0x10d   : > { %v1070_v31 = vpop.f32.mrf.mxu0  ;;  %v1082_v32 = vpop.f32.mrf.mxu1 }
 0x117   : > { %v625_v34 = vpop.f32.mrf.mxu0 }
 0x118   : > { %v631_v36 = vadd.f32 %v625_v34, %v542_v33 }
 0x119   : > { %v1093_v38 = vpop.f32.mrf.mxu0 }
 0x11a   : > { %v639_v40 = vmul.f32 %v1007_v35, %v631_v36 }
 0x11b   : > { %v628_v41 = vpop.f32.mrf.mxu0 }
 0x11c   : > { %v647_v42 = vadd.f32 %v1008_v37, %v639_v40 }
 0x11d   : > { %v1094_v43 = vpop.f32.mrf.mxu0 }
 0x11e   : > { %v648_v44 = vadd.f32 3.0, %v647_v42 }
 0x120   : > { %v649_v46 = vmax.f32 %v648_v44, 0.0 }
 0x122   : > { %v650_v48 = vmin.f32 %v649_v46, 6.0 }
 0x124   : > { %v651_v49 = vmul.f32 %v650_v48, %v647_v42 }
 0x126   : > { %v1556_v51 = vmul.f32 0.16666667, %v651_v49 }
 0x128   : > { %653 = vrot.lane.b32.xlu0 %v1556_v51, %s1333_s18  ;;  %v668_v2 = vmul.f32 %v1010_v56, %v1556_v51  ;;  %v708_v3 = vmul.f32 %v1016_v57, %v1556_v51  ;;  %v688_v10 = vmul.f32 %v1013_v1, %v1556_v51  ;;  %s382_s18 = scalar_lea.vmem [#allocation7], %s972_s22  ;;  %s1259_s22 = sshll.u32 %s1335_s17, 4  ;;  %s1260_s22 = int_to_ptr.vmem [resolvable:$false] %s1259_s22 }
 0x129   : > { %s1261_s28 = scalar_lea.vmem %s1260_s22, 256 }
 0x12c   : > { %655 = vrot.lane.b32.xlu0 %v1556_v51, %s1334_s20  ;;  %s883_s20 = sshll.u32 %s382_s18, 4  ;;  %s884_s20 = int_to_ptr.vmem [resolvable:$true] %s883_s20 }
 0x12d   : > { %s1255_s27 = scalar_lea.vmem %s884_s20, 128  ;;  %p1262_p11 = scmp.lt.s32.totalorder %s884_s20, %s1260_s22 }
 0x12e   : > { %p1256_p12 = scmp.ne.s32.totalorder %s884_s20, %s1255_s27  ;;  %p1263_p0 = scmp.lt.s32.totalorder %s1261_s28, %s1255_s27 }
 0x130   : > { %p1257_p7 = pnand %p1256_p12, %p1429_p5  ;;  %p1264_p1 = por %p1263_p0, %p1262_p11 }
 0x132   : > { %p1258_p8 = pneg %p1257_p7 }
 0x134   : > { %p1265_p3 = pnand %p1264_p1, %p1258_p8 }
 0x19a   : > { %v654_v58 = vpop.permute.xlu0 %653 }
 0x19b   : > { %v662_v60 = vmul.f32 %v1009_v54, %v654_v58  ;;  %v702_v61 = vmul.f32 %v1015_v55, %v654_v58  ;;  %v682_v5 = vmul.f32 %v1012_v59, %v654_v58 }
 0x19d   : > { %v669_v0 = vadd.f32 %v668_v2, %v662_v60  ;;  %v709_v7 = vadd.f32 %v708_v3, %v702_v61  ;;  %v689_v14 = vadd.f32 %v688_v10, %v682_v5 }
 0x19e   : > { %v656_v6 = vpop.permute.xlu0 %655 }
 0x19f   : > { %v675_v8 = vmul.f32 %v1011_v62, %v656_v6  ;;  %v715_v9 = vmul.f32 %v1017_v63, %v656_v6  ;;  %v695_v11 = vmul.f32 %v1014_v4, %v656_v6 }
 0x1a1   : > { %v676_v12 = vadd.f32 %v675_v8, %v669_v0  ;;  %v716_v13 = vadd.f32 %v715_v9, %v709_v7  ;;  %v696_v17 = vadd.f32 %v695_v11, %v689_v14 }
 0x1a3   : > { %v718_v15 = vrot.slane %v676_v12, 7  ;;  %v724_v16 = vrot.slane %v716_v13, 1 }
 0x1a5   : > { %v721_v18 = vsel %vm720_vm2, 0.0, %v718_v15  ;;  %v727_v21 = vsel %vm726_vm3, %v724_v16, 0.0 }
 0x1a6   : > { %v722_v19 = vadd.f32 %v721_v18, %v696_v17 }
 0x1a8   : > { %v728_v22 = vadd.f32 %v727_v21, %v722_v19 }
 0x1aa   : > { %v736_v24 = vmul.f32 %v1018_v20, %v728_v22 }
 0x1ac   : > { %v744_v25 = vadd.f32 %v1019_v23, %v736_v24 }
 0x1ae   : > { %v745_v26 = vmax.f32 %v744_v25, 0.0 }
 0x1b0   : > { %v746_v27 = vpack.c.bf16 %v745_v26, %v745_v26 }
 0x1b2   : > { %1112 = vmatmul.mubr.bf16.vlgmr.msra.gmra.mxu1 %v746_v27 }
 0x272   : > { %v845_v29 = vpop.f32.mrf.mxu1 }
 0x273   : > { %v858_v31 = vmul.f32 %v1028_v28, %v845_v29 }
 0x274   : > { %v1113_v32 = vpop.f32.mrf.mxu1 }
 0x275   : > { %v866_v33 = vadd.f32 %v1029_v30, %v858_v31 }
 0x276   : > { %v848_v34 = vpop.f32.mrf.mxu1 }
 0x277   : > { %v867_v35 = vadd.f32 %v866_v33, %v1556_v51 }
 0x278   : > { %v1114_v36 = vpop.f32.mrf.mxu1 }
 0x279   : > { %868 = vst [vmem:[%s382_s18] sm:$0xff] %v867_v35 }
 0x27a   : > { %1268 = shalt.err (!%p1265_p3)
}
 0x27b   : > { %s1269_s30 = scalar_lea.hbm %s1583_s29, 128  ;;  %s1273_s12 = scalar_lea.hbm %s1628_s10, 256 }
 0x27c   : > { %p1270_p2 = scmp.ne.s32.totalorder %s1583_s29, %s1269_s30  ;;  %p1274_p6 = scmp.lt.s32.totalorder %s1583_s29, %s1628_s10 }
 0x27d   : > { %p1275_p9 = scmp.lt.s32.totalorder %s1273_s12, %s1269_s30 }
 0x27e   : > { %p1271_p4 = pnand %p1270_p2, %p1429_p5 }
 0x27f   : > { %p1276_p10 = por %p1275_p9, %p1274_p6 }
 0x280   : > { %p1272_p13 = pneg %p1271_p4 }
 0x282   : > { %p1277_p12 = pnand %p1276_p10, %p1272_p13 }
 0x284   : > { %1280 = shalt.err (!%p1277_p12)
}
 0x285   : > { %1123 = dma.vmem_to_hbm [thread:$0]  (%p1429_p5), %s884_s20, 128, %s1583_s29, %s870_s11  }
 0x286 PF: > { %p1140_p7 = scmp.ge.s32.totalorder %s1323_s16, 2  ;;  %s895_s26 = sand.u32 1, %s1311_s13  }
 0x287   : > { %p1641_p8 = scmp.ne.s32.totalorder %s1634_s24, 0  ;;  %s896_s27 = scalar_lea.sflag [#allocation4], %s895_s26 }
 0x289   : > { %p1133_p11 = pnand %p1140_p7, %p1641_p8 }
 0x28b   : > { %p1134_p0 = pneg %p1133_p11 }
 0x28d   : > { %1306 = dma.done.wait (%p1134_p0), %s896_s27, 128  }
 0x28e   : > { %1308 = vsyncadd (%p1134_p0), %s896_s27, 4294967168  ;;  %s1642_s17 = sld [smem:[#allocation11_spill]]  ;;  %p22_p1 = scmp.ge.s32.totalorder %s1416_s19, 4  }
 0x28f   : > { %s1643_s15 = sld [smem:[#allocation12_spill]]  ;;  %s1644_s13 = smov %s1315_s14 }
 0x290   : > { %s1646_s16 = smov %s1416_s19  ;;  %24 = sbr.rel (!%p22_p1) target bundleno = 5 (0x5), region = 107 }
 0x294   : > { %s1645_s14 = smov %s1642_s17 }
 0x295   :  { %901 = vsyncpa [#allocation3], 1 }
 0x296   :  { %903 = vsyncpa [#allocation3 + $0x1], 1 }
 0x297   :  { %904 = vsyncpa [#allocation6], 1 }
 0x298   :  { %905 = vsyncpa [#allocation4], 1 }
 0x299   :  { %907 = vsyncpa [#allocation4 + $0x1], 1 }

</bundles_post_ra>
